<compile_context>
chip_gen: v7x
topology: tpu7x:2x2x1
jax: 0.10.0
libtpu: 0.0.40
codegen_flags: <defaults>
</compile_context>

<pallas_src>
import jax
import jax.numpy as jnp
from jax.experimental import pallas as pl
from jax.experimental.pallas import tpu as pltpu

_LANES = 512                      # lane-dense last dim (multiple of 128)
_TARGET_BLOCK_BYTES = 4 << 20     # ~4 MiB/block; 4 live buffers <= 16 MiB
_VMEM_LIMIT_BYTES = 32 << 20      # headroom on every generation (v5e..v7x)
_SUB_BYTE_DTYPE_TOKENS = ("int4", "uint4", "float4", "fp4", "e2m1")


def _identity_kernel(x_ref, o_ref):
    # Whole-tile copy: load the current VMEM block and store it unchanged.
    o_ref[...] = x_ref[...]


def _sublane_multiple(dtype) -> int:
    # (8,128) rule scales with packing: 8 for f32, 16 for bf16, 32 for int8.
    itemsize = jnp.dtype(dtype).itemsize
    return max(8, 32 // itemsize)


def module_forward(x: jax.Array) -> jax.Array:
    """True semantics of Module.forward: a no-op (identity, zero HBM traffic).

    Highest-value optimization from the review: the reference forward has no
    compute, so nothing should be launched at all.
    """
    return x


@jax.jit
def module_forward_pallas(x: jax.Array) -> jax.Array:
    """Pallas identity stand-in for Module.forward (lane-dense tiled copy)."""
    orig_shape = x.shape
    dtype = jnp.dtype(x.dtype)
    total = x.size

    # Degenerate / unsupported-packing cases: the exact no-op is also correct.
    if total == 0 or any(tok in dtype.name for tok in _SUB_BYTE_DTYPE_TOKENS):
        # TODO(synk): sub-byte dtypes need wider sublane packing than the
        #             itemsize heuristic provides; identity is exact anyway.
        return x

    itemsize = dtype.itemsize
    sub = _sublane_multiple(dtype)

    # Lane-dense (rows, _LANES) slab over the flattened tensor.  Pad only up
    # to the next multiple of _LANES (< 2 KiB) when the size is ragged.
    rows = pl.cdiv(total, _LANES)
    padded_total = rows * _LANES
    needs_pad = padded_total != total

    flat = x.reshape(-1)
    if needs_pad:
        flat = jnp.pad(flat, (0, padded_total - total))
    x2d = flat.reshape(rows, _LANES)

    # Block rows: aim for ~4 MiB per block, sublane-aligned.
    target_rows = max(sub, (_TARGET_BLOCK_BYTES // (_LANES * itemsize)) // sub * sub)
    if rows >= 2 * sub:
        # Keep >= 2 grid blocks so v7x's two TensorCores both get work.
        target_rows = min(target_rows, pl.cdiv(pl.cdiv(rows, 2), sub) * sub)
    if target_rows >= rows:
        block_rows = rows          # single full-extent block (small tensors)
    else:
        block_rows = target_rows   # ragged last block is masked by Pallas
    grid = (pl.cdiv(rows, block_rows),)

    # Alias only when padding produced a fresh jit-internal slab; aliasing the
    # non-donated jit parameter would add a hidden defensive full copy.
    aliases = {0: 0} if needs_pad else {}

    out2d = pl.pallas_call(
        _identity_kernel,
        out_shape=jax.ShapeDtypeStruct((rows, _LANES), dtype),
        grid=grid,
        in_specs=[pl.BlockSpec((block_rows, _LANES), lambda i: (i, 0))],
        out_specs=pl.BlockSpec((block_rows, _LANES), lambda i: (i, 0)),
        input_output_aliases=aliases,
        compiler_params=pltpu.CompilerParams(
            dimension_semantics=("parallel",),
            vmem_limit_bytes=_VMEM_LIMIT_BYTES,
        ),
        cost_estimate=pl.CostEstimate(
            flops=0,
            transcendentals=0,
            bytes_accessed=2 * padded_total * itemsize,
        ),
    )(x2d)

    if needs_pad:
        out_flat = out2d.reshape(-1)[:total]
        return out_flat.reshape(orig_shape)
    return out2d.reshape(orig_shape)


if __name__ == "__main__":
    key = jax.random.PRNGKey(0)
    # Small NCHW input consistent with a generic vision-style module.
    x = jax.random.normal(key, (2, 4, 16, 16), dtype=jnp.float32)

    # Production path: true no-op (zero traffic).
    y_fast = module_forward(x)
    assert y_fast is x or bool(jnp.all(y_fast == x))

    # Pallas identity stand-in: run the kernel once and verify.
    y = module_forward_pallas(x)
    jax.block_until_ready(y)

    assert y.shape == x.shape and y.dtype == x.dtype
    assert bool(jnp.all(y == x))
    print("KERNEL_OK")
</pallas_src>

<mosaic_0001>
module attributes {stable_mosaic.version = 11 : i64} {
  func.func @_identity_kernel(%arg0: i32, %arg1: memref<4x512xf32, #tpu.memory_space<vmem>>, %arg2: memref<4x512xf32, #tpu.memory_space<vmem>>) attributes {dimension_semantics = [#tpu.dimension_semantics<parallel>], iteration_bounds = array<i64: 1>, scalar_prefetch = 0 : i64, scratch_operands = 0 : i64, tpu.core_type = #tpu.core_type<tc>, window_params = [{transform_indices = @transform_0, window_bounds = array<i64: 4, 512>}, {transform_indices = @transform_1, window_bounds = array<i64: 4, 512>}]} {
    %c0 = arith.constant 0 : index
    %c0_0 = arith.constant 0 : index
    %0 = vector.load %arg1[%c0, %c0_0] : memref<4x512xf32, #tpu.memory_space<vmem>>, vector<4x512xf32>
    %c0_1 = arith.constant 0 : index
    %c0_2 = arith.constant 0 : index
    %1 = vector.load %arg2[%c0_1, %c0_2] : memref<4x512xf32, #tpu.memory_space<vmem>>, vector<4x512xf32>
    tpu.vector_store %arg2[%c0_1, %c0_2], %0 {strides = array<i32>} : memref<4x512xf32, #tpu.memory_space<vmem>>, vector<4x512xf32>,
    return
  }
  func.func @transform_0(%arg0: i32) -> (i32, i32) {
    %c0_i32 = arith.constant 0 : i32
    %c0_i32_0 = arith.constant 0 : i32
    return %arg0, %c0_i32 : i32, i32
  }
  func.func @transform_1(%arg0: i32) -> (i32, i32) {
    %c0_i32 = arith.constant 0 : i32
    %c0_i32_0 = arith.constant 0 : i32
    return %arg0, %c0_i32 : i32, i32
  }
}

</mosaic_0001>

<bundles_post_ra>
// kernel: module_forward_pallas.1
= control target key start
LH: loop header
LB: loop body
LE: loop exit
PB: predicated region body
PF: predicated region fallthrough
CT: control target
= control target key end

     0   :  { %s38_s0 = inlined_call_operand.vmem [shape: f32[4,512], index: 0, kind: input, shape index: {}]   ;;  %s39_s1 = inlined_call_operand.vmem [shape: f32[4,512], index: 1, kind: output, shape index: {}]  }
   0x1   :  { %v8_v0 = vld [vmem:[%s38_s0] sm:$0xff]  ;;  %v9_v1 = vld [vmem:[%s38_s0 + $0x8] sm:$0xff] }
   0x2   :  { %10 = vst [vmem:[%s39_s1] sm:$0xff] %v8_v0  ;;  %11 = vst [vmem:[%s39_s1 + $0x8] sm:$0xff] %v9_v1 }

</bundles_post_ra>
